<compile_context>
chip_gen: v7x
topology: tpu7x:2x2x1
jax: 0.10.0
libtpu: 0.0.40
codegen_flags: <defaults>
</compile_context>

<pallas_src>
import jax
import jax.numpy as jnp
from jax.experimental import pallas as pl
from jax.experimental.pallas import tpu as pltpu


def readout_kernel(x_ref, wpT_ref, w1pT_ref, w1edT_ref, b1_ref, w2_ref, b2_ref, out_ref):
    """One batch tile of `bt` graphs.

    x_ref     (bt, F, N)  f32   node embeddings, per-graph transposed
                                (features on sublanes, nodes on lanes)
    wpT_ref   (F, F)      bf16  layer_pooled weight, transposed (y = W^T x)
    w1pT_ref  (H, F)      bf16  readout layer 1, pooled slice, transposed
    w1edT_ref (2H, F)     bf16  readout layer 1, [expanded ; diff] slices, transposed
    b1_ref    (H, 1)      f32
    w2_ref    (H, 1)      f32   readout layer 2 weight column (output_dim == 1)
    b2_ref    (1,)  SMEM  f32   readout layer 2 bias scalar
    out_ref   (bt, N*N)   f32   one edge row per graph (edge e = i*N + j)
    """
    f32, bf16 = jnp.float32, jnp.bfloat16
    bt, n_feat, n_nodes = x_ref.shape
    n_hid = w1pT_ref.shape[0]
    nn = n_nodes * n_nodes

    x = x_ref[...]                                                    # (bt, F, N) f32

    # ---- pooled branch: node mean -> layer_pooled -> relu -> W1p slice -----------------
    # Kept broadcast over the N node lanes (all columns equal) so every matmul is a clean
    # batched (bt, *, F) x (bt, F, N) contraction — no degenerate 1-lane MXU matvec.
    mean_bn = jnp.broadcast_to(
        jnp.sum(x, axis=2, keepdims=True) * (1.0 / n_nodes), (bt, n_feat, n_nodes))
    wpT_b = jnp.broadcast_to(wpT_ref[...], (bt, n_feat, n_feat))
    h_pool = jnp.einsum('bgf,bfn->bgn', wpT_b, mean_bn.astype(bf16),
                        preferred_element_type=f32)                   # (bt, F, N)
    w1pT_b = jnp.broadcast_to(w1pT_ref[...], (bt, n_hid, n_feat))
    pool = jnp.einsum('bhf,bfn->bhn', w1pT_b,
                      jnp.maximum(h_pool, 0.0).astype(bf16),
                      preferred_element_type=f32)                     # (bt, H, N)

    # ---- per-node projections: [expanded ; diff] slices of readout layer 1 -------------
    relu_x = jnp.maximum(x, 0.0)                                      # f32 VPU
    w1edT_b = jnp.broadcast_to(w1edT_ref[...], (bt, 2 * n_hid, n_feat))
    pnode = jnp.einsum('bkf,bfn->bkn', w1edT_b, relu_x.astype(bf16),
                       preferred_element_type=f32)                    # (bt, 2H, N)
    # Fold the per-graph pooled term + b1 into the "i" projection: the old eb (per-graph)
    # expansion matmul disappears entirely.
    pe = pnode[:, :n_hid, :] + pool + b1_ref[...]                     # (bt, H, N)
    pd = pnode[:, n_hid:, :]                                          # (bt, H, N)

    # ---- expand per-node terms to the N*N edges of each graph --------------------------
    # Edge e = i*N + j.  Exact 0/1 selection matrices generated in-kernel in bf16:
    # no HBM DMA, per-graph contraction K = N.  e // N is computed via f32 truncation of
    # (e + 0.5)/N (exact for N < 2048); integer vector division is avoided on purpose.
    n_row = jax.lax.broadcasted_iota(jnp.int32, (n_nodes, nn), 0)
    e_lane = jax.lax.broadcasted_iota(jnp.int32, (n_nodes, nn), 1)
    i_of_e = ((e_lane.astype(f32) + 0.5) * (1.0 / n_nodes)).astype(jnp.int32)   # e // N
    j_of_e = e_lane - i_of_e * n_nodes                                          # e %  N
    sel_i = jnp.broadcast_to((n_row == i_of_e).astype(bf16), (bt, n_nodes, nn))
    sel_j = jnp.broadcast_to((n_row == j_of_e).astype(bf16), (bt, n_nodes, nn))

    h_pre = (jnp.einsum('bhn,bne->bhe', pe.astype(bf16), sel_i,
                        preferred_element_type=f32)
             + jnp.einsum('bhn,bne->bhe', pd.astype(bf16), sel_j,
                          preferred_element_type=f32))                # (bt, H, N*N)
    h = jnp.maximum(h_pre, 0.0)                                       # f32 VPU

    # ---- final projection (output_dim == 1): VPU multiply + sublane reduce -------------
    # Skips a degenerate (ne, H) x (H, 1) MXU matmul; result is one edge row per graph.
    out = jnp.sum(h * w2_ref[...], axis=1) + b2_ref[0]                # (bt, N*N)
    out_ref[...] = out.astype(out_ref.dtype)


def readout_layer_multidim(x, params, *, batch_tile=None):
    """x: (B, N, F) float32 node embeddings. Returns (B, N, N, O) with O == 1."""
    B, N, F = x.shape
    wp = params["w_pool"]            # (F, F)   layer_pooled.weight.T (in, out)
    w1 = params["w1"]                # (3F, H)  readout layer 1 weight.T
    b1 = params["b1"]                # (H,)
    w2 = params["w2"]                # (H, O)   readout layer 2 weight.T
    b2 = params["b2"]                # (O,)
    H = w1.shape[1]
    O = w2.shape[1]
    assert w1.shape[0] == 3 * F
    assert O == 1, "kernel is specialised to output_dim == 1 (module default)"
    NN = N * N

    # Batch tile: the output block is (bt, N*N), so bt must equal B or be a multiple of 8
    # (sublane quantum).  Default to >=2 grid steps whenever that constraint allows it so
    # the "parallel" grid axis can shard across v7x's two TensorCores.
    if batch_tile is None:
        bt = B // 2 if (B % 2 == 0 and (B // 2) % 8 == 0) else B
    else:
        bt = batch_tile
    assert B % bt == 0
    assert bt == B or bt % 8 == 0, (
        "batch_tile must equal B or be a multiple of 8 (output-block sublane rule)")
    n_tiles = B // bt
    # TODO(synk): for very large N, additionally tile the edge (N*N) axis so the
    # (bt, H, N*N) intermediates stay well inside VMEM on v7x (64 MiB).

    # --- operand prep: per-graph transposed activations, bf16 weights -------------------
    x3 = jnp.transpose(x, (0, 2, 1)).astype(jnp.float32)                        # (B, F, N)
    wpT = wp.T.astype(jnp.bfloat16)                                             # (F, F)
    w1pT = w1[:F].T.astype(jnp.bfloat16)                                        # (H, F)
    w1edT = jnp.concatenate([w1[F:2 * F].T, w1[2 * F:].T], 0).astype(jnp.bfloat16)  # (2H, F)
    b1c = b1.reshape(H, 1).astype(jnp.float32)
    w2c = w2.reshape(H, 1).astype(jnp.float32)
    b2s = b2.reshape(1).astype(jnp.float32)

    out_flat = pl.pallas_call(
        readout_kernel,
        out_shape=jax.ShapeDtypeStruct((B, NN), jnp.float32),
        grid_spec=pltpu.PrefetchScalarGridSpec(
            num_scalar_prefetch=0,
            grid=(n_tiles,),
            in_specs=[
                pl.BlockSpec((bt, F, N), lambda g: (g, 0, 0)),        # x (batch tile)
                pl.BlockSpec((F, F), lambda g: (0, 0)),               # wpT (bf16)
                pl.BlockSpec((H, F), lambda g: (0, 0)),               # w1pT (bf16)
                pl.BlockSpec((2 * H, F), lambda g: (0, 0)),           # w1edT (bf16)
                pl.BlockSpec((H, 1), lambda g: (0, 0)),               # b1 column
                pl.BlockSpec((H, 1), lambda g: (0, 0)),               # w2 column
                pl.BlockSpec(memory_space=pltpu.MemorySpace.SMEM),    # b2 scalar
            ],
            out_specs=pl.BlockSpec((bt, NN), lambda g: (g, 0)),       # edge rows per graph
        ),
        compiler_params=pltpu.CompilerParams(
            dimension_semantics=("parallel",),
            # Explicit, re-derived VMEM budget: per-step residents are O(100 KB) at these
            # shapes (the big one-hots are generated in-kernel); 32 MiB is within the
            # physical VMEM of v5e/v6e (128 MiB) and v7x (64 MiB).
            vmem_limit_bytes=32 * 1024 * 1024,
        ),
    )(x3, wpT, w1pT, w1edT, b1c, w2c, b2s)
    return out_flat.reshape(B, N, N, O)


def reference_forward(x, params):
    """Pure-JAX (f32) re-implementation of the PyTorch forward, for verification."""
    B, N, F = x.shape
    h_pooled = (jnp.sum(x, axis=1) / N) @ params["w_pool"]                          # (B, F)
    f_exp = jnp.broadcast_to(x[:, :, None, :], (B, N, N, F)).reshape(B, N * N, F)   # x[i]
    f_diff = jnp.broadcast_to(x[:, None, :, :], (B, N, N, F)).reshape(B, N * N, F)  # x[j]
    f_pooled = jnp.broadcast_to(h_pooled[:, None, :], (B, N * N, F))
    feats = jax.nn.relu(jnp.concatenate([f_pooled, f_exp, f_diff], axis=-1))
    h = jax.nn.relu(feats @ params["w1"] + params["b1"])
    out = h @ params["w2"] + params["b2"]
    return out.reshape(B, N, N, -1)


if __name__ == "__main__":
    # Small, deterministic example shapes (n_hid=[32], output_dim=1).
    B, N, F = 2, 8, 32          # batch, nodes, n_features
    H, O = 32, 1

    key = jax.random.PRNGKey(0)
    kx, kp, k1, kb1, k2, kb2 = jax.random.split(key, 6)

    x = jax.random.normal(kx, (B, N, F), dtype=jnp.float32)
    params = {
        "w_pool": jax.random.normal(kp, (F, F), dtype=jnp.float32) / jnp.sqrt(F),
        "w1": jax.random.normal(k1, (3 * F, H), dtype=jnp.float32) / jnp.sqrt(3 * F),
        "b1": jax.random.normal(kb1, (H,), dtype=jnp.float32) * 0.1,
        "w2": jax.random.normal(k2, (H, O), dtype=jnp.float32) / jnp.sqrt(H),
        "b2": jax.random.normal(kb2, (O,), dtype=jnp.float32) * 0.1,
    }

    out = jax.block_until_ready(readout_layer_multidim(x, params))
    ref = jax.block_until_ready(reference_forward(x, params))

    assert out.shape == (B, N, N, O), out.shape
    # Tolerance sized for bf16 MXU operands (f32 accumulation, f32 elementwise math,
    # plus one extra bf16 rounding of pe/pd before the exact one-hot expansion).
    assert jnp.allclose(out, ref, rtol=3e-2, atol=3e-2), "mismatch vs JAX reference"

    print("KERNEL_OK")
</pallas_src>

<mosaic_0001>
module attributes {stable_mosaic.version = 11 : i64} {
  func.func @readout_kernel(%arg0: i32, %arg1: memref<2x32x8xf32, #tpu.memory_space<vmem>>, %arg2: memref<32x32xbf16, #tpu.memory_space<vmem>>, %arg3: memref<32x32xbf16, #tpu.memory_space<vmem>>, %arg4: memref<64x32xbf16, #tpu.memory_space<vmem>>, %arg5: memref<32x1xf32, #tpu.memory_space<vmem>>, %arg6: memref<32x1xf32, #tpu.memory_space<vmem>>, %arg7: memref<1xf32, #tpu.memory_space<smem>>, %arg8: memref<2x64xf32, #tpu.memory_space<vmem>>) attributes {dimension_semantics = [#tpu.dimension_semantics<parallel>], iteration_bounds = array<i64: 1>, scalar_prefetch = 0 : i64, scratch_operands = 0 : i64, tpu.core_type = #tpu.core_type<tc>, window_params = [{transform_indices = @transform_0, window_bounds = array<i64: 2, 32, 8>}, {pipeline_mode = #tpu.pipeline_mode<synchronous>, transform_indices = @transform_1, window_bounds = array<i64: 32, 32>}, {pipeline_mode = #tpu.pipeline_mode<synchronous>, transform_indices = @transform_2, window_bounds = array<i64: 32, 32>}, {pipeline_mode = #tpu.pipeline_mode<synchronous>, transform_indices = @transform_3, window_bounds = array<i64: 64, 32>}, {pipeline_mode = #tpu.pipeline_mode<synchronous>, transform_indices = @transform_4, window_bounds = array<i64: 32, 1>}, {pipeline_mode = #tpu.pipeline_mode<synchronous>, transform_indices = @transform_5, window_bounds = array<i64: 32, 1>}, {transform_indices = @transform_6, window_bounds = array<i64: 1>}, {transform_indices = @transform_7, window_bounds = array<i64: 2, 64>}]} {
    %c0 = arith.constant 0 : index
    %c0_0 = arith.constant 0 : index
    %c0_1 = arith.constant 0 : index
    %0 = vector.load %arg1[%c0, %c0_0, %c0_1] : memref<2x32x8xf32, #tpu.memory_space<vmem>>, vector<2x32x8xf32>
    %cst = arith.constant dense<0.000000e+00> : vector<2x32xf32>
    %1 = vector.multi_reduction <add>, %0, %cst [2] : vector<2x32x8xf32> to vector<2x32xf32>
    %2 = vector.shape_cast %1 : vector<2x32xf32> to vector<2x32x1xf32>
    %cst_2 = arith.constant 1.250000e-01 : f32
    %3 = vector.broadcast %cst_2 : f32 to vector<2x32x1xf32>
    %4 = arith.mulf %2, %3 : vector<2x32x1xf32>
    %5 = vector.shape_cast %4 : vector<2x32x1xf32> to vector<2x32x1xf32>
    %6 = vector.broadcast %5 : vector<2x32x1xf32> to vector<2x32x8xf32>
    %c0_3 = arith.constant 0 : index
    %c0_4 = arith.constant 0 : index
    %7 = vector.load %arg2[%c0_3, %c0_4] : memref<32x32xbf16, #tpu.memory_space<vmem>>, vector<32x32xbf16>
    %8 = vector.shape_cast %7 : vector<32x32xbf16> to vector<1x32x32xbf16>
    %9 = vector.broadcast %8 : vector<1x32x32xbf16> to vector<2x32x32xbf16>
    %10 = arith.truncf %6 : vector<2x32x8xf32> to vector<2x32x8xbf16>
    "tpu.trace_start"() <{level = 10 : i32, message = "bgf,bfn->bgn"}> : () -> ()
    %cst_5 = arith.constant dense<0.000000e+00> : vector<2x32x8xf32>
    %11 = tpu.matmul %9, %10, %cst_5 {dimension_numbers = #tpu.dot_dimension_numbers<[2], [1], [1], [2], [0, 0, 0, 1, 1, 2], [0], [0]>} : vector<2x32x32xbf16>, vector<2x32x8xbf16>, vector<2x32x8xf32> -> vector<2x32x8xf32>
    "tpu.trace_stop"() : () -> ()
    %c0_6 = arith.constant 0 : index
    %c0_7 = arith.constant 0 : index
    %12 = vector.load %arg3[%c0_6, %c0_7] : memref<32x32xbf16, #tpu.memory_space<vmem>>, vector<32x32xbf16>
    %13 = vector.shape_cast %12 : vector<32x32xbf16> to vector<1x32x32xbf16>
    %14 = vector.broadcast %13 : vector<1x32x32xbf16> to vector<2x32x32xbf16>
    %cst_8 = arith.constant 0.000000e+00 : f32
    %15 = vector.broadcast %cst_8 : f32 to vector<2x32x8xf32>
    %16 = arith.maximumf %11, %15 : vector<2x32x8xf32>
    %17 = arith.truncf %16 : vector<2x32x8xf32> to vector<2x32x8xbf16>
    "tpu.trace_start"() <{level = 10 : i32, message = "bhf,bfn->bhn"}> : () -> ()
    %cst_9 = arith.constant dense<0.000000e+00> : vector<2x32x8xf32>
    %18 = tpu.matmul %14, %17, %cst_9 {dimension_numbers = #tpu.dot_dimension_numbers<[2], [1], [1], [2], [0, 0, 0, 1, 1, 2], [0], [0]>} : vector<2x32x32xbf16>, vector<2x32x8xbf16>, vector<2x32x8xf32> -> vector<2x32x8xf32>
    "tpu.trace_stop"() : () -> ()
    %cst_10 = arith.constant 0.000000e+00 : f32
    %19 = vector.broadcast %cst_10 : f32 to vector<2x32x8xf32>
    %20 = arith.maximumf %0, %19 : vector<2x32x8xf32>
    %c0_11 = arith.constant 0 : index
    %c0_12 = arith.constant 0 : index
    %21 = vector.load %arg4[%c0_11, %c0_12] : memref<64x32xbf16, #tpu.memory_space<vmem>>, vector<64x32xbf16>
    %22 = vector.shape_cast %21 : vector<64x32xbf16> to vector<1x64x32xbf16>
    %23 = vector.broadcast %22 : vector<1x64x32xbf16> to vector<2x64x32xbf16>
    %24 = arith.truncf %20 : vector<2x32x8xf32> to vector<2x32x8xbf16>
    "tpu.trace_start"() <{level = 10 : i32, message = "bkf,bfn->bkn"}> : () -> ()
    %cst_13 = arith.constant dense<0.000000e+00> : vector<2x64x8xf32>
    %25 = tpu.matmul %23, %24, %cst_13 {dimension_numbers = #tpu.dot_dimension_numbers<[2], [1], [1], [2], [0, 0, 0, 1, 1, 2], [0], [0]>} : vector<2x64x32xbf16>, vector<2x32x8xbf16>, vector<2x64x8xf32> -> vector<2x64x8xf32>
    "tpu.trace_stop"() : () -> ()
    %26 = vector.extract_strided_slice %25 {offsets = [0, 0, 0], sizes = [2, 32, 8], strides = [1, 1, 1]} : vector<2x64x8xf32> to vector<2x32x8xf32>
    %27 = arith.addf %26, %18 : vector<2x32x8xf32>
    %c0_14 = arith.constant 0 : index
    %c0_15 = arith.constant 0 : index
    %28 = vector.load %arg5[%c0_14, %c0_15] : memref<32x1xf32, #tpu.memory_space<vmem>>, vector<32x1xf32>
    %29 = vector.shape_cast %28 : vector<32x1xf32> to vector<1x32x1xf32>
    %30 = vector.broadcast %29 : vector<1x32x1xf32> to vector<2x32x8xf32>
    %31 = arith.addf %27, %30 : vector<2x32x8xf32>
    %32 = vector.extract_strided_slice %25 {offsets = [0, 32, 0], sizes = [2, 32, 8], strides = [1, 1, 1]} : vector<2x64x8xf32> to vector<2x32x8xf32>
    %33 = tpu.iota {dimensions = array<i32: 0>} : vector<8x64xi32>
    %34 = tpu.iota {dimensions = array<i32: 1>} : vector<8x64xi32>
    %35 = arith.sitofp %34 : vector<8x64xi32> to vector<8x64xf32>
    %cst_16 = arith.constant 5.000000e-01 : f32
    %36 = vector.broadcast %cst_16 : f32 to vector<8x64xf32>
    %37 = arith.addf %35, %36 : vector<8x64xf32>
    %cst_17 = arith.constant 1.250000e-01 : f32
    %38 = vector.broadcast %cst_17 : f32 to vector<8x64xf32>
    %39 = arith.mulf %37, %38 : vector<8x64xf32>
    %40 = arith.fptosi %39 : vector<8x64xf32> to vector<8x64xi32>
    %c8_i32 = arith.constant 8 : i32
    %41 = vector.broadcast %c8_i32 : i32 to vector<8x64xi32>
    %42 = arith.muli %40, %41 : vector<8x64xi32>
    %43 = arith.subi %34, %42 : vector<8x64xi32>
    %44 = arith.cmpi eq, %33, %40 : vector<8x64xi32>
    %45 = arith.extui %44 : vector<8x64xi1> to vector<8x64xi32>
    %46 = arith.sitofp %45 : vector<8x64xi32> to vector<8x64xf32>
    %47 = arith.truncf %46 : vector<8x64xf32> to vector<8x64xbf16>
    %48 = vector.shape_cast %47 : vector<8x64xbf16> to vector<1x8x64xbf16>
    %49 = vector.broadcast %48 : vector<1x8x64xbf16> to vector<2x8x64xbf16>
    %50 = arith.cmpi eq, %33, %43 : vector<8x64xi32>
    %51 = arith.extui %50 : vector<8x64xi1> to vector<8x64xi32>
    %52 = arith.sitofp %51 : vector<8x64xi32> to vector<8x64xf32>
    %53 = arith.truncf %52 : vector<8x64xf32> to vector<8x64xbf16>
    %54 = vector.shape_cast %53 : vector<8x64xbf16> to vector<1x8x64xbf16>
    %55 = vector.broadcast %54 : vector<1x8x64xbf16> to vector<2x8x64xbf16>
    %56 = arith.truncf %31 : vector<2x32x8xf32> to vector<2x32x8xbf16>
    "tpu.trace_start"() <{level = 10 : i32, message = "bhn,bne->bhe"}> : () -> ()
    %cst_18 = arith.constant dense<0.000000e+00> : vector<2x32x64xf32>
    %57 = tpu.matmul %56, %49, %cst_18 {dimension_numbers = #tpu.dot_dimension_numbers<[2], [1], [1], [2], [0, 0, 0, 1, 1, 2], [0], [0]>} : vector<2x32x8xbf16>, vector<2x8x64xbf16>, vector<2x32x64xf32> -> vector<2x32x64xf32>
    "tpu.trace_stop"() : () -> ()
    %58 = arith.truncf %32 : vector<2x32x8xf32> to vector<2x32x8xbf16>
    "tpu.trace_start"() <{level = 10 : i32, message = "bhn,bne->bhe"}> : () -> ()
    %cst_19 = arith.constant dense<0.000000e+00> : vector<2x32x64xf32>
    %59 = tpu.matmul %58, %55, %cst_19 {dimension_numbers = #tpu.dot_dimension_numbers<[2], [1], [1], [2], [0, 0, 0, 1, 1, 2], [0], [0]>} : vector<2x32x8xbf16>, vector<2x8x64xbf16>, vector<2x32x64xf32> -> vector<2x32x64xf32>
    "tpu.trace_stop"() : () -> ()
    %60 = arith.addf %57, %59 : vector<2x32x64xf32>
    %cst_20 = arith.constant 0.000000e+00 : f32
    %61 = vector.broadcast %cst_20 : f32 to vector<2x32x64xf32>
    %62 = arith.maximumf %60, %61 : vector<2x32x64xf32>
    %c0_21 = arith.constant 0 : index
    %c0_22 = arith.constant 0 : index
    %63 = vector.load %arg6[%c0_21, %c0_22] : memref<32x1xf32, #tpu.memory_space<vmem>>, vector<32x1xf32>
    %64 = vector.shape_cast %63 : vector<32x1xf32> to vector<1x32x1xf32>
    %65 = vector.broadcast %64 : vector<1x32x1xf32> to vector<2x32x64xf32>
    %66 = arith.mulf %62, %65 : vector<2x32x64xf32>
    %cst_23 = arith.constant dense<0.000000e+00> : vector<2x64xf32>
    %67 = vector.multi_reduction <add>, %66, %cst_23 [1] : vector<2x32x64xf32> to vector<2x64xf32>
    %c0_24 = arith.constant 0 : index
    %68 = memref.load %arg7[%c0_24] : memref<1xf32, #tpu.memory_space<smem>>
    %69 = vector.broadcast %68 : f32 to vector<2x64xf32>
    %70 = arith.addf %67, %69 : vector<2x64xf32>
    %c0_25 = arith.constant 0 : index
    %c0_26 = arith.constant 0 : index
    %71 = vector.load %arg8[%c0_25, %c0_26] : memref<2x64xf32, #tpu.memory_space<vmem>>, vector<2x64xf32>
    tpu.vector_store %arg8[%c0_25, %c0_26], %70 {strides = array<i32>} : memref<2x64xf32, #tpu.memory_space<vmem>>, vector<2x64xf32>,
    return
  }
  func.func @transform_0(%arg0: i32) -> (i32, i32, i32) {
    %c0_i32 = arith.constant 0 : i32
    %c0_i32_0 = arith.constant 0 : i32
    %c0_i32_1 = arith.constant 0 : i32
    return %arg0, %c0_i32, %c0_i32_0 : i32, i32, i32
  }
  func.func @transform_1(%arg0: i32) -> (i32, i32) {
    %c0_i32 = arith.constant 0 : i32
    %c0_i32_0 = arith.constant 0 : i32
    %c0_i32_1 = arith.constant 0 : i32
    return %c0_i32, %c0_i32_0 : i32, i32
  }
  func.func @transform_2(%arg0: i32) -> (i32, i32) {
    %c0_i32 = arith.constant 0 : i32
    %c0_i32_0 = arith.constant 0 : i32
    %c0_i32_1 = arith.constant 0 : i32
    return %c0_i32, %c0_i32_0 : i32, i32
  }
  func.func @transform_3(%arg0: i32) -> (i32, i32) {
    %c0_i32 = arith.constant 0 : i32
    %c0_i32_0 = arith.constant 0 : i32
    %c0_i32_1 = arith.constant 0 : i32
    return %c0_i32, %c0_i32_0 : i32, i32
  }
  func.func @transform_4(%arg0: i32) -> (i32, i32) {
    %c0_i32 = arith.constant 0 : i32
    %c0_i32_0 = arith.constant 0 : i32
    %c0_i32_1 = arith.constant 0 : i32
    return %c0_i32, %c0_i32_0 : i32, i32
  }
  func.func @transform_5(%arg0: i32) -> (i32, i32) {
    %c0_i32 = arith.constant 0 : i32
    %c0_i32_0 = arith.constant 0 : i32
    %c0_i32_1 = arith.constant 0 : i32
    return %c0_i32, %c0_i32_0 : i32, i32
  }
  func.func @transform_6(%arg0: i32) -> i32 {
    %c0_i32 = arith.constant 0 : i32
    %c0_i32_0 = arith.constant 0 : i32
    return %c0_i32 : i32
  }
  func.func @transform_7(%arg0: i32) -> (i32, i32) {
    %c0_i32 = arith.constant 0 : i32
    %c0_i32_0 = arith.constant 0 : i32
    return %arg0, %c0_i32 : i32, i32
  }
}

</mosaic_0001>

<bundles_post_ra>
// kernel: tpu_custom_call.1
= control target key start
LH: loop header
LB: loop body
LE: loop exit
PB: predicated region body
PF: predicated region fallthrough
CT: control target
= control target key end

     0   :  { %vm37_vm0 = vcmask 64512   ;;  %s1297_s0 = inlined_call_operand.vmem [shape: f32[2,32,8], index: 0, kind: input, shape index: {}]   ;;  %s1298_s1 = inlined_call_operand.vmem [shape: bf16[32,32], index: 1, kind: input, shape index: {}]   ;;  %s1299_s2 = inlined_call_operand.vmem [shape: bf16[32,32], index: 2, kind: input, shape index: {}]   ;;  %s1300_s3 = inlined_call_operand.vmem [shape: bf16[64,32], index: 3, kind: input, shape index: {}]   ;;  %s1301_s4 = inlined_call_operand.vmem [shape: f32[32,1], index: 4, kind: input, shape index: {}]   ;;  %s1302_s5 = inlined_call_operand.vmem [shape: f32[32,1], index: 5, kind: input, shape index: {}]   ;;  %s1303_s6 = inlined_call_operand.<no memory space> [shape: f32[1], index: 6, kind: input, shape index: {}]   ;;  %s1304_s7 = inlined_call_operand.hbm [shape: f32[2,64], index: 7, kind: output, shape index: {}]  }
   0x1   :  { %v1149_v0 = vld [vmem:[%s1297_s0 + $0x20] sm:$0xff]  ;;  %v1159_v2 = vld [vmem:[%s1297_s0 + $0x28] sm:$0xff]  ;;  %v1173_v6 = vld [vmem:[%s1297_s0 + $0x18] sm:$0xff] }
   0x2   :  { %v1154_v1 = vld [vmem:[%s1297_s0] sm:$0xff]  ;;  %v50_v3 = vsel %vm37_vm0, %v1149_v0, 0.0  ;;  %v1168_v5 = vld [vmem:[%s1297_s0 + $0x8] sm:$0xff]  ;;  %v1178_v7 = vld [vmem:[%s1297_s0 + $0x10] sm:$0xff]  ;;  %v53_v8 = vsel %vm37_vm0, %v1159_v2, 0.0  ;;  %v47_v10 = vsel %vm37_vm0, %v1173_v6, 0.0 }
   0x3   :  { %v38_v4 = vsel %vm37_vm0, %v1154_v1, 0.0  ;;  %51 = vadd.xlane.f32.xlu1 %v50_v3  ;;  %v41_v9 = vsel %vm37_vm0, %v1168_v5, 0.0  ;;  %v44_v11 = vsel %vm37_vm0, %v1178_v7, 0.0  ;;  %v36_v12 = vld [vmem:[%s1297_s0 + $0x38] sm:$0xff]  ;;  %v35_v13 = vld [vmem:[%s1297_s0 + $0x30] sm:$0xff] }
   0x4   :  { %39 = vadd.xlane.f32.xlu0 %v38_v4 }
   0x7   :  { %54 = vadd.xlane.f32.xlu1 %v53_v8 }
   0x8   :  { %42 = vadd.xlane.f32.xlu0 %v41_v9 }
   0xb   :  { %48 = vadd.xlane.f32.xlu1 %v47_v10 }
   0xc   :  { %45 = vadd.xlane.f32.xlu0 %v44_v11 }
   0xd   :  { %13 = vsyncpa [#allocation4], 0  ;;  %v59_v14 = vsel %vm37_vm0, %v36_v12, 0.0  ;;  %v56_v15 = vsel %vm37_vm0, %v35_v13, 0.0  ;;  %v1071_v16 = vld [vmem:[%s1298_s1] sm:$0xff]   ;;  %vm88_vm1 = vcmask 261120  }
   0xe   :  { %968 = vmatprep.mubr.msk.bf16.mxu0 %vm88_vm1, %v1071_v16  ;;  %976 = vmatprep.mubr.msk.bf16.mxu1 %vm88_vm1, %v1071_v16  ;;  %v1072_v36 = vld [vmem:[%s1298_s1 + $0x8] sm:$0xff]   ;;  %v1073_v38 = vld [vmem:[%s1299_s2] sm:$0xff]   ;;  %v323_v39 = vmax.f32 %v1154_v1, 0.0  ;;  %v324_v40 = vmax.f32 %v1168_v5, 0.0  ;;  %v327_v41 = vmax.f32 %v1149_v0, 0.0  ;;  %v328_v42 = vmax.f32 %v1159_v2, 0.0 }
   0xf   :  { %60 = vadd.xlane.f32.xlu1 %v59_v14  ;;  %v326_v43 = vmax.f32 %v1173_v6, 0.0  ;;  %v325_v44 = vmax.f32 %v1178_v7, 0.0  ;;  %v330_v45 = vmax.f32 %v36_v12, 0.0  ;;  %v329_v46 = vmax.f32 %v35_v13, 0.0  ;;  %v514_v51 = vld [vmem:[%s1301_s4 + $0x8] sm:$0xff]  ;;  %v513_v52 = vld [vmem:[%s1301_s4] sm:$0xff] }
  0x10   :  { %57 = vadd.xlane.f32.xlu0 %v56_v15  ;;  %v339_v47 = vpack.c.bf16 %v324_v40, %v323_v39  ;;  %v341_v48 = vpack.c.bf16 %v328_v42, %v327_v41  ;;  %v1103_v53 = vmov 0   ;;  %v515_v54 = vld [vmem:[%s1301_s4 + $0x10] sm:$0xff]  ;;  %v516_v55 = vld [vmem:[%s1301_s4 + $0x18] sm:$0xff]  ;;  %v806_v56 = vld [vmem:[%s1302_s5] sm:$0xff]  ;;  %vm577_vm3 = vcmask 1043456   ;;  %s1105_s21 = smov [#allocation3]  }
  0x11   :  { %v340_v49 = vpack.c.bf16 %v326_v43, %v325_v44  ;;  %v342_v50 = vpack.c.bf16 %v330_v45, %v329_v46  ;;  %1070 = vset.pattern.permute.xlu1 %v1103_v53  ;;  %1069 = vset.pattern.permute.xlu0 %v1103_v53  ;;  %v807_v57 = vld [vmem:[%s1302_s5 + $0x8] sm:$0xff]  ;;  %v808_v58 = vld [vmem:[%s1302_s5 + $0x10] sm:$0xff]  ;;  %v809_v59 = vld [vmem:[%s1302_s5 + $0x18] sm:$0xff]  ;;  %vm838_vm5 = vcmask 523264   ;;  %s882_s1 = sshll.u32 %s1105_s21, 4  ;;  %vm871_vm6 = vcmask 1041409   ;;  %s883_s1 = int_to_ptr.vmem [resolvable:$true] %s882_s1 }
  0x12   :  { %v1074_v16 = vld [vmem:[%s1299_s2 + $0x8] sm:$0xff]   ;;  %vm874_vm7 = vcmask 517120   ;;  %s1079_s22 = scalar_lea.vmem %s883_s1, 32  ;;  %p1084_p1 = scmp.lt.s32.totalorder %s883_s1, %s883_s1 }
  0x13   :  { %p1080_p0 = scmp.ne.s32.totalorder %s883_s1, %s1079_s22  ;;  %p1085_p2 = scmp.lt.s32.totalorder %s1079_s22, %s1079_s22 }
  0x15   :  { %p1086_p3 = por %p1085_p2, %p1084_p1 }
  0x17   :  { %p1087_p4 = pnand %p1086_p3, %p1080_p0 }
  0x20   :  { %524 = vperm.xlu1 %1070, %v514_v51  }
  0x24   :  { %529 = vperm.xlu1 %1070, %v515_v54  }
  0x26   :  { %519 = vperm.xlu0 %1069, %v513_v52  }
  0x28   :  { %534 = vperm.xlu1 %1070, %v516_v55  }
  0x2c   :  { %812 = vperm.xlu1 %1070, %v806_v56  }
  0x30   :  { %817 = vperm.xlu1 %1070, %v807_v57  }
  0x34   :  { %822 = vperm.xlu1 %1070, %v808_v58  }
  0x38   :  { %827 = vperm.xlu1 %1070, %v809_v59  }
  0x90   :  { %v52_v17 = vpop.xlane.xlu1 %51 }
  0x91   :  { %v40_v18 = vpop.xlane.xlu0 %39  ;;  %v66_v21 = vmul.f32 0.125, %v52_v17  ;;  %v1075_v17 = vld [vmem:[%s1300_s3] sm:$0xff]  }
  0x92   :  { %v62_v22 = vmul.f32 0.125, %v40_v18  ;;  %v1076_v18 = vld [vmem:[%s1300_s3 + $0x8] sm:$0xff]  }
  0x94   :  { %v55_v19 = vpop.xlane.xlu1 %54 }
  0x95   :  { %v43_v20 = vpop.xlane.xlu0 %42  ;;  %v67_v23 = vmul.f32 0.125, %v55_v19  ;;  %v1077_v19 = vld [vmem:[%s1300_s3 + $0x10] sm:$0xff]  }
  0x96   :  { %v63_v24 = vmul.f32 0.125, %v43_v20  ;;  %v1078_v20 = vld [vmem:[%s1300_s3 + $0x18] sm:$0xff]  }
  0x97   :  { %v76_v26 = vpack.c.bf16 %v67_v23, %v66_v21  ;;  %v545_v21 = vlaneseq }
  0x98   :  { %v74_v25 = vpack.c.bf16 %v63_v24, %v62_v22  ;;  %v49_v27 = vpop.xlane.xlu1 %48 }
  0x99   :  { %v46_v28 = vpop.xlane.xlu0 %45  ;;  %v65_v29 = vmul.f32 0.125, %v49_v27  ;;  %972 = vmatprep.subr.bf16.mxu1 %v76_v26  ;;  %v548_v22 = vand.u32 127, %v545_v21 }
  0x9a   :  { %v64_v30 = vmul.f32 0.125, %v46_v28  ;;  %964 = vmatprep.subr.bf16.mxu0 %v74_v25  ;;  %973 = vmatpush3.bf16.msra.mxu1 %v76_v26 }
  0x9b   :  { %965 = vmatpush3.bf16.msra.mxu0 %v74_v25  ;;  %v549_v23 = vcvt.s32.f32 %v548_v22 }
  0x9c   :  { %v75_v31 = vpack.c.bf16 %v65_v29, %v64_v30  ;;  %v61_v32 = vpop.xlane.xlu1 %60  ;;  %v546_v29 = vshrl.u32 %v545_v21, 7 }
  0x9d   :  { %v58_v33 = vpop.xlane.xlu0 %57  ;;  %v69_v34 = vmul.f32 0.125, %v61_v32  ;;  %v550_v24 = vadd.f32 0.5, %v549_v23 }
  0x9e   :  { %v68_v35 = vmul.f32 0.125, %v58_v33  ;;  %966 = vmatprep.subr.bf16.mxu0 %v75_v31 }
  0x9f   :  { %967 = vmatpush3.bf16.msra.mxu0 %v75_v31  ;;  %v551_v25 = vmul.f32 0.125, %v550_v24  ;;  %v1104_v31 = vmov 0.0  }
  0xa0   :  { %v77_v37 = vpack.c.bf16 %v69_v34, %v68_v35 }
  0xa1   :  { %v1064_v26 = vtrunc.f32 %v551_v25 }
  0xa2   :  { %969 = vmatmul.mubr.msk.bf16.vlgmr.msra.gmra.mrb[0].mxu0 %vm88_vm1, %v1072_v36  ;;  %974 = vmatprep.subr.bf16.mxu1 %v77_v37 }
  0xa3   :  { %975 = vmatpush3.bf16.msra.mxu1 %v77_v37  ;;  %984 = vmatprep.mubr.msk.bf16.mxu0 %vm88_vm1, %v1073_v38  ;;  %v1065_v27 = vcvt.f32.s32 %v1064_v26 }
  0xa5   :  { %v553_v28 = vmul.u32 8, %v1065_v27  ;;  %vm555_vm4 = vcmp.eq.s32.totalorder %v546_v29, %v1065_v27  ;;  %v520_v43 = vpop.permute.xlu0 %519 }
  0xa6   :  { %977 = vmatmul.mubr.msk.bf16.vlgmr.msra.gmra.mrb[0].mxu1 %vm88_vm1, %v1072_v36  ;;  %v914_v35 = vsel %vm555_vm4, 1.0, %v1104_v31 }
  0xa7   :  { %992 = vmatprep.mubr.msk.bf16.mxu1 %vm88_vm1, %v1073_v38  ;;  %v554_v30 = vsub.s32 %v548_v22, %v553_v28  ;;  %v558_v36 = vpack.c.bf16 %v914_v35, %v914_v35  ;;  %v525_v38 = vpop.permute.xlu1 %524 }
  0xa9   :  { %vm559_vm2 = vcmp.eq.s32.totalorder %v546_v29, %v554_v30  ;;  %v692_v37 = vsel %vm577_vm3, %v558_v36, 0 }
  0xaa   :  { %v915_v32 = vsel %vm559_vm2, 1.0, %v1104_v31 }
  0xab   :  { %v562_v33 = vpack.c.bf16 %v915_v32, %v915_v32  ;;  %v530_v39 = vpop.permute.xlu1 %529 }
  0xad   :  { %v579_v34 = vsel %vm577_vm3, %v562_v33, 0 }
  0xaf   :  { %v535_v41 = vpop.permute.xlu1 %534 }
 0x175   :  { %v970_v60 = vpop.f32.mrb[0].mxu0 }
 0x176   :  { %v199_v61 = vmax.f32 %v970_v60, 0.0  ;;  %v129_v62 = vpop.f32.mrb[1].mxu0 }
 0x177   :  { %v197_v63 = vmax.f32 %v129_v62, 0.0  ;;  %v971_v0 = vpop.f32.mrb[2].mxu0 }
 0x178   :  { %v200_v1 = vmax.f32 %v971_v0, 0.0  ;;  %v132_v2 = vpop.f32.mrb[3].mxu0 }
 0x179   :  { %v198_v3 = vmax.f32 %v132_v2, 0.0  ;;  %v978_v4 = vpop.f32.mrb[0].mxu1 }
 0x17a   :  { %v206_v5 = vpack.c.bf16 %v200_v1, %v199_v61  ;;  %v178_v6 = vpop.f32.mrb[1].mxu1  ;;  %v203_v9 = vmax.f32 %v978_v4, 0.0 }
 0x17b   :  { %v205_v7 = vpack.c.bf16 %v198_v3, %v197_v63  ;;  %v979_v8 = vpop.f32.mrb[2].mxu1  ;;  %v201_v12 = vmax.f32 %v178_v6, 0.0 }
 0x17c   :  { %v204_v10 = vmax.f32 %v979_v8, 0.0  ;;  %v181_v11 = vpop.f32.mrb[3].mxu1 }
 0x17d   :  { %v202_v13 = vmax.f32 %v181_v11, 0.0  ;;  %980 = vmatprep.subr.bf16.mxu0 %v205_v7 }
 0x17e   :  { %v208_v14 = vpack.c.bf16 %v204_v10, %v203_v9  ;;  %981 = vmatpush3.bf16.msra.mxu0 %v205_v7  ;;  %v813_v10 = vpop.permute.xlu1 %812 }
 0x17f   :  { %v207_v15 = vpack.c.bf16 %v202_v13, %v201_v12  ;;  %982 = vmatprep.subr.bf16.mxu0 %v206_v5 }
 0x181   :  { %988 = vmatprep.subr.bf16.mxu1 %v207_v15 }
 0x182   :  { %983 = vmatpush3.bf16.msra.mxu0 %v206_v5  ;;  %989 = vmatpush3.bf16.msra.mxu1 %v207_v15  ;;  %v818_v11 = vpop.permute.xlu1 %817 }
 0x183   :  { %990 = vmatprep.subr.bf16.mxu1 %v208_v14  ;;  %996 = vmatprep.subr.bf16.mxu0 %v339_v47 }
 0x185   :  { %985 = vmatmul.mubr.msk.bf16.vlgmr.msra.gmra.mrb[4].mxu0 %vm88_vm1, %v1074_v16 }
 0x186   :  { %991 = vmatpush3.bf16.msra.mxu1 %v208_v14  ;;  %997 = vmatpush3.bf16.msra.mxu0 %v339_v47  ;;  %v823_v12 = vpop.permute.xlu1 %822 }
 0x187   :  { %1008 = vmatprep.subr.bf16.mxu1 %v341_v48  ;;  %998 = vmatprep.subr.bf16.mxu0 %v340_v49 }
 0x188   :  { %1000 = vmatprep.mubr.msk.bf16.mxu0 %vm88_vm1, %v1075_v17 }
 0x189   :  { %993 = vmatmul.mubr.msk.bf16.vlgmr.msra.gmra.mrb[4].mxu1 %vm88_vm1, %v1074_v16 }
 0x18a   :  { %1009 = vmatpush3.bf16.msra.mxu1 %v341_v48  ;;  %999 = vmatpush3.bf16.msra.mxu0 %v340_v49  ;;  %v828_v24 = vpop.permute.xlu1 %827 }
 0x18b   :  { %1010 = vmatprep.subr.bf16.mxu1 %v342_v50  ;;  %1012 = vmatprep.mubr.msk.bf16.mxu1 %vm88_vm1, %v1075_v17 }
 0x18c   :  { %1060 = vmatprep.subr.msk.bf16.mxu0 %vm577_vm3, %v562_v33 }
 0x18e   :  { %1011 = vmatpush3.bf16.msra.mxu1 %v342_v50 }
 0x18f   :  { %1061 = vmatprep.subr.msk.bf16.mxu1 %vm577_vm3, %v562_v33 }
 0x191   :  { %1001 = vmatmul.mubr.msk.bf16.vlgmr.msra.gmra.mrb[4].mxu0 %vm88_vm1, %v1076_v18 }
 0x192   :  { %1004 = vmatprep.mubr.msk.bf16.mxu0 %vm88_vm1, %v1077_v19  ;;  %1021 = vmatpush3.bf16.msra.mxu0 %v579_v34 }
 0x193   :  { %1062 = vmatprep.subr.msk.bf16.mxu0 %vm577_vm3, %v558_v36 }
 0x195   :  { %1013 = vmatmul.mubr.msk.bf16.vlgmr.msra.gmra.mrb[4].mxu1 %vm88_vm1, %v1076_v18 }
 0x196   :  { %1016 = vmatprep.mubr.msk.bf16.mxu1 %vm88_vm1, %v1077_v19  ;;  %1027 = vmatpush3.bf16.msra.mxu1 %v579_v34 }
 0x197   :  { %1063 = vmatprep.subr.msk.bf16.mxu1 %vm577_vm3, %v558_v36 }
 0x199   :  { %1005 = vmatmul.mubr.msk.bf16.gmra.mrb[8].mxu0 %vm88_vm1, %v1078_v20 }
 0x19d   :  { %1017 = vmatmul.mubr.msk.bf16.gmra.mrb[8].mxu1 %vm88_vm1, %v1078_v20 }
 0x264   :  { %v1002_v40 = vpop.f32.mrb[4].mxu0 }
 0x265   :  { %v409_v42 = vpop.f32.mrb[5].mxu0  ;;  %v539_v45 = vadd.f32 %v1002_v40, %v530_v39 }
 0x266   :  { %v1003_v44 = vpop.f32.mrb[6].mxu0  ;;  %v537_v48 = vadd.f32 %v520_v43, %v409_v42 }
 0x267   :  { %v540_v46 = vadd.f32 %v1003_v44, %v535_v41  ;;  %v412_v47 = vpop.f32.mrb[7].mxu0 }
 0x268   :  { %v538_v49 = vadd.f32 %v525_v38, %v412_v47  ;;  %v1014_v50 = vpop.f32.mrb[4].mxu1 }
 0x269   :  { %v564_v51 = vpack.c.bf16 %v540_v46, %v539_v45  ;;  %v474_v52 = vpop.f32.mrb[5].mxu1  ;;  %v543_v55 = vadd.f32 %v1014_v50, %v530_v39 }
 0x26a   :  { %v563_v53 = vpack.c.bf16 %v538_v49, %v537_v48  ;;  %v1015_v54 = vpop.f32.mrb[6].mxu1  ;;  %v541_v58 = vadd.f32 %v520_v43, %v474_v52 }
 0x26b   :  { %v544_v56 = vadd.f32 %v1015_v54, %v535_v41  ;;  %v477_v57 = vpop.f32.mrb[7].mxu1 }
 0x26c   :  { %v542_v59 = vadd.f32 %v525_v38, %v477_v57  ;;  %v1006_v60 = vpop.f32.mrb[8].mxu0 }
 0x26d   :  { %v566_v61 = vpack.c.bf16 %v544_v56, %v543_v55  ;;  %v425_v62 = vpop.f32.mrb[9].mxu0 }
 0x26e   :  { %v565_v63 = vpack.c.bf16 %v542_v59, %v541_v58  ;;  %v1007_v0 = vpop.f32.mrb[10].mxu0 }
 0x26f   :  { %v568_v1 = vpack.c.bf16 %v1007_v0, %v1006_v60  ;;  %v428_v2 = vpop.f32.mrb[11].mxu0 }
 0x270   :  { %v567_v3 = vpack.c.bf16 %v428_v2, %v425_v62  ;;  %v1018_v4 = vpop.f32.mrb[8].mxu1 }
 0x271   :  { %v490_v5 = vpop.f32.mrb[9].mxu1 }
 0x272   :  { %v1019_v6 = vpop.f32.mrb[10].mxu1  ;;  %1022 = vmatprep.mubr.msk.bf16.mxu0 %vm37_vm0, %v567_v3 }
 0x273   :  { %v570_v7 = vpack.c.bf16 %v1019_v6, %v1018_v4  ;;  %v493_v8 = vpop.f32.mrb[11].mxu1  ;;  %1023 = vmatmul.mubr.msk.bf16.vlgmr.msra.gmra.mrb[12].mxu0 %vm37_vm0, %v568_v1 }
 0x274   :  { %v569_v9 = vpack.c.bf16 %v493_v8, %v490_v5  ;;  %1034 = vmatprep.mubr.msk.bf16.mxu0 %vm37_vm0, %v563_v53  ;;  %1033 = vmatpush3.bf16.msra.mxu0 %v692_v37 }
 0x276   :  { %1028 = vmatprep.mubr.msk.bf16.mxu1 %vm37_vm0, %v569_v9 }
 0x277   :  { %1029 = vmatmul.mubr.msk.bf16.vlgmr.msra.gmra.mrb[12].mxu1 %vm37_vm0, %v570_v7 }
 0x278   :  { %1039 = vmatpush3.bf16.msra.mxu1 %v692_v37  ;;  %1040 = vmatprep.mubr.msk.bf16.mxu1 %vm37_vm0, %v565_v63  ;;  %v866_v63 = vstv %s1303_s6 }
 0x27f   :  { %1035 = vmatmul.mubr.msk.bf16.vlgmr.msra.gmra.mrb[12].mxu0 %vm37_vm0, %v564_v51 }
 0x283   :  { %1041 = vmatmul.mubr.msk.bf16.vlgmr.msra.gmra.mrb[12].mxu1 %vm37_vm0, %v566_v61 }
 0x352   :  { %v1036_v13 = vpop.f32.mrb[12].mxu0 }
 0x353   :  { %v728_v14 = vpop.f32.mrb[13].mxu0  ;;  %v800_v15 = vmax.f32 %v1036_v13, 0.0 }
 0x354   :  { %v798_v16 = vmax.f32 %v728_v14, 0.0  ;;  %v1037_v17 = vpop.f32.mrb[14].mxu0 }
 0x355   :  { %v801_v18 = vmax.f32 %v1037_v17, 0.0  ;;  %v731_v19 = vpop.f32.mrb[15].mxu0  ;;  %v832_v25 = vmul.f32 %v823_v12, %v800_v15 }
 0x356   :  { %v830_v20 = vmul.f32 %v813_v10, %v798_v16  ;;  %v799_v21 = vmax.f32 %v731_v19, 0.0  ;;  %v1042_v22 = vpop.f32.mrb[12].mxu1 }
 0x357   :  { %v783_v23 = vpop.f32.mrb[13].mxu1  ;;  %v804_v27 = vmax.f32 %v1042_v22, 0.0  ;;  %v833_v31 = vmul.f32 %v828_v24, %v801_v18  ;;  %v842_v38 = vsel %vm838_vm5, %v832_v25, 0.0 }
 0x358   :  { %v831_v26 = vmul.f32 %v818_v11, %v799_v21  ;;  %v802_v28 = vmax.f32 %v783_v23, 0.0  ;;  %v1043_v29 = vpop.f32.mrb[14].mxu1  ;;  %v839_v30 = vsel %vm838_vm5, %v830_v20, 0.0 }
 0x359   :  { %v786_v32 = vpop.f32.mrb[15].mxu1  ;;  %v805_v35 = vmax.f32 %v1043_v29, 0.0  ;;  %v836_v39 = vmul.f32 %v823_v12, %v804_v27  ;;  %v844_v42 = vsel %vm838_vm5, %v833_v31, 0.0 }
 0x35a   :  { %v840_v33 = vsel %vm838_vm5, %v831_v26, 0.0  ;;  %v834_v34 = vmul.f32 %v813_v10, %v802_v28  ;;  %v803_v36 = vmax.f32 %v786_v32, 0.0 }
 0x35b   :  { %v841_v37 = vadd.f32 %v840_v33, %v839_v30  ;;  %v837_v44 = vmul.f32 %v828_v24, %v805_v35  ;;  %v855_v48 = vsel %vm838_vm5, %v836_v39, 0.0 }
 0x35c   :  { %v835_v40 = vmul.f32 %v818_v11, %v803_v36  ;;  %v852_v43 = vsel %vm838_vm5, %v834_v34, 0.0 }
 0x35d   :  { %v843_v41 = vadd.f32 %v842_v38, %v841_v37  ;;  %v857_v51 = vsel %vm838_vm5, %v837_v44, 0.0 }
 0x35e   :  { %v853_v45 = vsel %vm838_vm5, %v835_v40, 0.0 }
 0x35f   :  { %v845_v46 = vadd.f32 %v844_v42, %v843_v41  ;;  %v854_v47 = vadd.f32 %v853_v45, %v852_v43 }
 0x361   :  { %v846_v49 = vrot.slane %v845_v46, 4  ;;  %v856_v50 = vadd.f32 %v855_v48, %v854_v47 }
 0x363   :  { %v847_v52 = vadd.f32 %v846_v49, %v845_v46  ;;  %v858_v53 = vadd.f32 %v857_v51, %v856_v50 }
 0x365   :  { %v848_v54 = vrot.slane %v847_v52, 2  ;;  %v859_v55 = vrot.slane %v858_v53, 4 }
 0x367   :  { %v860_v56 = vadd.f32 %v859_v55, %v858_v53  ;;  %v849_v57 = vadd.f32 %v848_v54, %v847_v52 }
 0x369   :  { %v861_v58 = vrot.slane %v860_v56, 2  ;;  %v850_v59 = vrot.slane %v849_v57, 1 }
 0x36b   :  { %v862_v60 = vadd.f32 %v861_v58, %v860_v56  ;;  %v851_v61 = vadd.f32 %v850_v59, %v849_v57 }
 0x36d   :  { %v863_v62 = vrot.slane %v862_v60, 1  ;;  %v867_v1 = vadd.f32 %v866_v63, %v851_v61 }
 0x36f   :  { %v864_v0 = vadd.f32 %v863_v62, %v862_v60 }
 0x371   :  { %v868_v2 = vadd.f32 %v866_v63, %v864_v0 }
 0x373   :  { %v872_v3 = vsel %vm871_vm6, %v868_v2, %v867_v1 }
 0x374   :  { %875 = vst.msk [vmem:[#allocation3] sm:$0x3] %vm874_vm7, %v872_v3 }
 0x375   :  { %1090 = shalt.err (!%p1087_p4)
}
 0x376   :  { %s1091_s6 = scalar_lea.hbm %s1304_s7, 32 }
 0x377   :  { %p1092_p5 = scmp.ne.s32.totalorder %s1304_s7, %s1091_s6  ;;  %p1095_p6 = scmp.lt.u32.totalorder %s1091_s6, %s1304_s7 }
 0x379   :  { %p1097_p7 = pnand %p1095_p6, %p1092_p5 }
 0x37b   :  { %1100 = shalt.err (!%p1097_p7)
}
 0x37c   :  { %885 = dma.vmem_to_hbm [thread:$0]  %s883_s1, 32, %s1304_s7, [#allocation4]  }
 0x37d   :  { %1101 = dma.done.wait [#allocation4], 32  }
 0x37e   :  { %1102 = vsyncadd [#allocation4], 4294967264 }
 0x37f   :  { %889 = vsyncpa [#allocation4], 1 }

</bundles_post_ra>
